<compile_context>
chip_gen: v5e
topology: v5e:2x2
jax: 0.10.0
libtpu: 0.0.40
codegen_flags: <defaults>
</compile_context>

<pallas_src>
import jax
import jax.numpy as jnp
from jax.experimental import pallas as pl
from jax.experimental.pallas import tpu as pltpu

SEL_COLS = (17, 19, 21, 23, 25, 27, 29)   # start_logits[:, [17,19,...,29]]
NUM_CLASS = len(SEL_COLS)                  # = 7


def _mrc_kernel(x_ref, wenc_t_ref, benc_ref, wstart_ref, bqa_ref, out_ref):
    # x_ref:      [D, B*C] bf16  masked embeddings of the selected tokens;
    #                            column j = b*C + c (class axis on lanes)
    # wenc_t_ref: [D, D]   bf16  synthetic encoder weight, transposed
    # benc_ref:   [D, 1]   f32   encoder bias as a column (broadcast over lanes)
    # wstart_ref: [1, D]   bf16  QA-head start-logit weight column as a row
    # bqa_ref:    [1, 1]   f32   QA-head start bias (scalar, SMEM)
    # out_ref:    [B, C]   f32   per-batch log-softmax over the class axis

    # Encoder stand-in (transposed): h^T = tanh(Wenc^T @ x^T + b_enc).
    # bf16 operands, f32 accumulate; bias add + tanh in f32.
    h = jnp.tanh(
        jnp.dot(wenc_t_ref[...], x_ref[...],
                preferred_element_type=jnp.float32)
        + benc_ref[...])                                           # [D, B*C] f32

    # QA head start logits for every selected token: [1, B*C] (lane-dense row).
    logits = jnp.dot(wstart_ref[...], h.astype(jnp.bfloat16),
                     preferred_element_type=jnp.float32) + bqa_ref[0, 0]

    # LogSoftmax(dim=1) per batch element; class axis sits on lanes.
    B, C = out_ref.shape
    for b in range(B):                                # static unroll, B tiny
        row = logits[:, b * C:(b + 1) * C]                         # [1, C]
        m = jnp.max(row, axis=-1, keepdims=True)
        z = row - m
        lse = jnp.log(jnp.sum(jnp.exp(z), axis=-1, keepdims=True))
        out_ref[pl.ds(b, 1), :] = z - lse


def roberta_mrc_all_isear_forward(input_ids, attention_mask, params):
    B, S = input_ids.shape
    D = params["word_emb"].shape[1]
    C = NUM_CLASS
    sel = jnp.array(SEL_COLS, jnp.int32)

    # ---- glue (plain JAX): gather ONLY the 7 selected token positions ------
    # Hoisting the selection before the "encoder" is exact here because the
    # stand-in encoder is per-token; mask is folded in here as well (it is
    # applied to embeddings, matching the reference; SEL_COLS lie in the
    # unmasked region for this test).
    sel_ids = input_ids[:, sel]                                          # [B, C]
    emb = (params["word_emb"][sel_ids]
           + params["pos_emb"][sel][None, :, :]).astype(jnp.float32)    # [B, C, D]
    mask = attention_mask[:, sel].astype(jnp.float32)[:, :, None]       # [B, C, 1]
    x = emb * mask                                                       # [B, C, D]

    # Transposed, lane-dense layout: columns indexed by b*C + c.
    x_cols = x.reshape(B * C, D).T.astype(jnp.bfloat16)                  # [D, B*C]
    wenc_t = params["wenc"].T.astype(jnp.bfloat16)                       # [D, D]
    benc_col = params["benc"].astype(jnp.float32).reshape(D, 1)          # [D, 1]
    wstart_row = params["wqa"][:, 0].astype(jnp.bfloat16).reshape(1, D)  # [1, D]
    bqa00 = params["bqa"][0].astype(jnp.float32).reshape(1, 1)           # [1, 1]

    out = pl.pallas_call(
        _mrc_kernel,
        out_shape=jax.ShapeDtypeStruct((B, C), jnp.float32),
        in_specs=[
            pl.BlockSpec(memory_space=pltpu.MemorySpace.VMEM),   # x_cols
            pl.BlockSpec(memory_space=pltpu.MemorySpace.VMEM),   # W_enc^T
            pl.BlockSpec(memory_space=pltpu.MemorySpace.VMEM),   # b_enc column
            pl.BlockSpec(memory_space=pltpu.MemorySpace.VMEM),   # W_qa[:,0] row
            pl.BlockSpec(memory_space=pltpu.MemorySpace.SMEM),   # b_qa[0] scalar
        ],
        out_specs=pl.BlockSpec(memory_space=pltpu.MemorySpace.VMEM),
    )(x_cols, wenc_t, benc_col, wstart_row, bqa00)

    # Module returns the same tensor twice.
    return out, out


def _reference(input_ids, attention_mask, params):
    """Pure-f32 JAX reference of the same synthetic forward (full sequence)."""
    S = input_ids.shape[1]
    emb = params["word_emb"][input_ids] + params["pos_emb"][None, :S, :]
    x = emb * attention_mask[:, :, None].astype(jnp.float32)
    h = jnp.tanh(x @ params["wenc"] + params["benc"])
    start_logits = (h @ params["wqa"] + params["bqa"])[:, :, 0]          # [B, S]
    sel = start_logits[:, jnp.array(SEL_COLS)]                           # [B, 7]
    return jax.nn.log_softmax(sel, axis=1)


if __name__ == "__main__":
    B, S, D, VOCAB = 2, 32, 64, 100   # S >= 30 so columns 17..29 exist
    key = jax.random.PRNGKey(0)
    ks = jax.random.split(key, 12)

    params = {
        "word_emb": jax.random.normal(ks[0], (VOCAB, D), jnp.float32) * 0.02,
        "pos_emb":  jax.random.normal(ks[1], (S, D), jnp.float32) * 0.02,
        "wenc":     jax.random.normal(ks[2], (D, D), jnp.float32) / jnp.sqrt(D),
        "benc":     jax.random.normal(ks[3], (D,), jnp.float32) * 0.01,
        "wqa":      jax.random.normal(ks[4], (D, 2), jnp.float32) / jnp.sqrt(D),
        "bqa":      jax.random.normal(ks[5], (2,), jnp.float32) * 0.01,
        # Declared in __init__ but never used in forward (fc1/fc2/fc3/batchnorm);
        # initialized here (scaled-down dims) only for parity with the module.
        "fc1_w": jax.random.normal(ks[6], (D, D // 2), jnp.float32) / jnp.sqrt(D),
        "fc1_b": jnp.zeros((D // 2,), jnp.float32),
        "fc2_w": jax.random.normal(ks[7], (D // 2, NUM_CLASS), jnp.float32),
        "fc2_b": jnp.zeros((NUM_CLASS,), jnp.float32),
        "fc3_w": jax.random.normal(ks[8], (D // 4, NUM_CLASS), jnp.float32),
        "fc3_b": jnp.zeros((NUM_CLASS,), jnp.float32),
        "bn_gamma": jnp.ones((D // 2,), jnp.float32),
        "bn_beta":  jnp.zeros((D // 2,), jnp.float32),
    }

    input_ids = jax.random.randint(ks[9], (B, S), 0, VOCAB, jnp.int32)
    attention_mask = jnp.ones((B, S), jnp.int32).at[:, 30:].set(0)  # pad tail

    out1, out2 = roberta_mrc_all_isear_forward(input_ids, attention_mask, params)
    out1 = jax.block_until_ready(out1)

    ref = _reference(input_ids, attention_mask, params)
    assert out1.shape == (B, NUM_CLASS)
    # bf16 MXU inputs with f32 accumulation → small deviation vs pure-f32 ref.
    assert jnp.allclose(out1, ref, atol=5e-3, rtol=1e-3), (out1, ref)
    # log-softmax rows must exp-sum to 1 (computed fully in f32 in-kernel)
    assert jnp.allclose(jnp.exp(out1).sum(axis=1), 1.0, atol=1e-4)

    print("KERNEL_OK")
</pallas_src>

<mosaic_0001>
module attributes {stable_mosaic.version = 11 : i64} {
  func.func @_mrc_kernel(%arg0: memref<64x14xbf16, #tpu.memory_space<vmem>>, %arg1: memref<64x64xbf16, #tpu.memory_space<vmem>>, %arg2: memref<64x1xf32, #tpu.memory_space<vmem>>, %arg3: memref<1x64xbf16, #tpu.memory_space<vmem>>, %arg4: memref<1x1xf32, #tpu.memory_space<smem>>, %arg5: memref<2x7xf32, #tpu.memory_space<vmem>>) attributes {dimension_semantics = [], scalar_prefetch = 0 : i64, scratch_operands = 0 : i64, tpu.core_type = #tpu.core_type<tc>} {
    %c0 = arith.constant 0 : index
    %c0_0 = arith.constant 0 : index
    %0 = vector.load %arg1[%c0, %c0_0] : memref<64x64xbf16, #tpu.memory_space<vmem>>, vector<64x64xbf16>
    %c0_1 = arith.constant 0 : index
    %c0_2 = arith.constant 0 : index
    %1 = vector.load %arg0[%c0_1, %c0_2] : memref<64x14xbf16, #tpu.memory_space<vmem>>, vector<64x14xbf16>
    %cst = arith.constant dense<0.000000e+00> : vector<64x14xf32>
    %2 = tpu.matmul %0, %1, %cst {dimension_numbers = #tpu.dot_dimension_numbers<[1], [0], [0], [1], [0, 0, 1, 1], [], []>} : vector<64x64xbf16>, vector<64x14xbf16>, vector<64x14xf32> -> vector<64x14xf32>
    %c0_3 = arith.constant 0 : index
    %c0_4 = arith.constant 0 : index
    %3 = vector.load %arg2[%c0_3, %c0_4] : memref<64x1xf32, #tpu.memory_space<vmem>>, vector<64x1xf32>
    %4 = vector.broadcast %3 : vector<64x1xf32> to vector<64x14xf32>
    %5 = arith.addf %2, %4 : vector<64x14xf32>
    %6 = math.tanh %5 : vector<64x14xf32>
    %c0_5 = arith.constant 0 : index
    %c0_6 = arith.constant 0 : index
    %7 = vector.load %arg3[%c0_5, %c0_6] : memref<1x64xbf16, #tpu.memory_space<vmem>>, vector<1x64xbf16>
    %8 = arith.truncf %6 : vector<64x14xf32> to vector<64x14xbf16>
    %cst_7 = arith.constant dense<0.000000e+00> : vector<1x14xf32>
    %9 = tpu.matmul %7, %8, %cst_7 {dimension_numbers = #tpu.dot_dimension_numbers<[1], [0], [0], [1], [0, 0, 1, 1], [], []>} : vector<1x64xbf16>, vector<64x14xbf16>, vector<1x14xf32> -> vector<1x14xf32>
    %c0_8 = arith.constant 0 : index
    %c0_9 = arith.constant 0 : index
    %10 = memref.load %arg4[%c0_8, %c0_9] : memref<1x1xf32, #tpu.memory_space<smem>>
    %11 = vector.broadcast %10 : f32 to vector<1x14xf32>
    %12 = arith.addf %9, %11 : vector<1x14xf32>
    %13 = vector.extract_strided_slice %12 {offsets = [0, 0], sizes = [1, 7], strides = [1, 1]} : vector<1x14xf32> to vector<1x7xf32>
    %cst_10 = arith.constant dense<0xFF800000> : vector<1xf32>
    %14 = vector.multi_reduction <maximumf>, %13, %cst_10 [1] : vector<1x7xf32> to vector<1xf32>
    %15 = vector.shape_cast %14 : vector<1xf32> to vector<1x1xf32>
    %16 = vector.broadcast %15 : vector<1x1xf32> to vector<1x7xf32>
    %17 = arith.subf %13, %16 : vector<1x7xf32>
    %18 = math.exp %17 : vector<1x7xf32>
    %cst_11 = arith.constant dense<0.000000e+00> : vector<1xf32>
    %19 = vector.multi_reduction <add>, %18, %cst_11 [1] : vector<1x7xf32> to vector<1xf32>
    %20 = vector.shape_cast %19 : vector<1xf32> to vector<1x1xf32>
    %21 = math.log %20 : vector<1x1xf32>
    %22 = vector.broadcast %21 : vector<1x1xf32> to vector<1x7xf32>
    %23 = arith.subf %17, %22 : vector<1x7xf32>
    %c0_12 = arith.constant 0 : index
    %c0_13 = arith.constant 0 : index
    %24 = vector.load %arg5[%c0_12, %c0_13] : memref<2x7xf32, #tpu.memory_space<vmem>>, vector<1x7xf32>
    tpu.vector_store %arg5[%c0_12, %c0_13], %23 {strides = array<i32>} : memref<2x7xf32, #tpu.memory_space<vmem>>, vector<1x7xf32>,
    %25 = vector.extract_strided_slice %12 {offsets = [0, 7], sizes = [1, 7], strides = [1, 1]} : vector<1x14xf32> to vector<1x7xf32>
    %cst_14 = arith.constant dense<0xFF800000> : vector<1xf32>
    %26 = vector.multi_reduction <maximumf>, %25, %cst_14 [1] : vector<1x7xf32> to vector<1xf32>
    %27 = vector.shape_cast %26 : vector<1xf32> to vector<1x1xf32>
    %28 = vector.broadcast %27 : vector<1x1xf32> to vector<1x7xf32>
    %29 = arith.subf %25, %28 : vector<1x7xf32>
    %30 = math.exp %29 : vector<1x7xf32>
    %cst_15 = arith.constant dense<0.000000e+00> : vector<1xf32>
    %31 = vector.multi_reduction <add>, %30, %cst_15 [1] : vector<1x7xf32> to vector<1xf32>
    %32 = vector.shape_cast %31 : vector<1xf32> to vector<1x1xf32>
    %33 = math.log %32 : vector<1x1xf32>
    %34 = vector.broadcast %33 : vector<1x1xf32> to vector<1x7xf32>
    %35 = arith.subf %29, %34 : vector<1x7xf32>
    %c1 = arith.constant 1 : index
    %c0_16 = arith.constant 0 : index
    %36 = vector.load %arg5[%c1, %c0_16] : memref<2x7xf32, #tpu.memory_space<vmem>>, vector<1x7xf32>
    tpu.vector_store %arg5[%c1, %c0_16], %35 {strides = array<i32>} : memref<2x7xf32, #tpu.memory_space<vmem>>, vector<1x7xf32>,
    return
  }
}

</mosaic_0001>

<bundles_post_ra>
// kernel: tpu_custom_call.1
= control target key start
LH: loop header
LB: loop body
LE: loop exit
PB: predicated region body
PF: predicated region fallthrough
CT: control target
= control target key end

     0   :  { %v365_v1 = vmov 0   ;;  %s465_s0 = inlined_call_operand.vmem [shape: bf16[64,14], index: 0, kind: input, shape index: {}]   ;;  %s466_s1 = inlined_call_operand.vmem [shape: bf16[64,64], index: 1, kind: input, shape index: {}]   ;;  %s467_s2 = inlined_call_operand.vmem [shape: f32[64,1], index: 2, kind: input, shape index: {}]   ;;  %s468_s3 = inlined_call_operand.vmem [shape: bf16[1,64], index: 3, kind: input, shape index: {}]   ;;  %s469_s4 = inlined_call_operand.<no memory space> [shape: f32[1,1], index: 4, kind: input, shape index: {}]   ;;  %s470_s5 = inlined_call_operand.hbm [shape: f32[2,7], index: 5, kind: output, shape index: {}]  }
   0x1   :  { %v300_v0 = vld [vmem:[%s465_s0 + $0x18] sm:$0xff]  ;;  %313 = vset.pattern.permute.xlu1 %v365_v1  ;;  %312 = vset.pattern.permute.xlu0 %v365_v1  ;;  %v299_v2 = vld [vmem:[%s465_s0 + $0x10] sm:$0xff]  ;;  %v43_v4 = vld [vmem:[%s467_s2 + $0x20] sm:$0xff] }
   0x2   :  { %302 = vmatpush.bf16.msra.mxu3 %v300_v0  ;;  %148 = vmatpush.bf16.msra.mxu0 %v300_v0  ;;  %v45_v3 = vld [vmem:[%s467_s2 + $0x30] sm:$0xff] }
   0x3   :  { %301 = vmatpush.bf16.msra.mxu2 %v300_v0  ;;  %79 = vperm.xlu0 %312, %v45_v3   ;;  %v41_v5 = vld [vmem:[%s467_s2 + $0x10] sm:$0xff] }
   0x4   :  { %69 = vperm.xlu1 %313, %v43_v4   ;;  %314 = vset.pattern.permute.xlu2 %v365_v1 }
   0x5   :  { %59 = vperm.xlu2 %314, %v41_v5  }
   0x6   :  { %11 = vsyncpa [#allocation4], 0  ;;  %304 = vmatpush.bf16.msra.mxu3 %v299_v2  ;;  %v298_v6 = vld [vmem:[%s465_s0 + $0x8] sm:$0xff]  ;;  %149 = vmatpush.bf16.msra.mxu0 %v299_v2  ;;  %v46_v7 = vld [vmem:[%s467_s2 + $0x38] sm:$0xff]  ;;  %vm131_vm0 = vcmask 523264   ;;  %v187_v54 = vstv %s469_s4  ;;  %vm218_vm1 = vcmask 106552  }
   0x7   :  { %303 = vmatpush.bf16.msra.mxu2 %v299_v2  ;;  %v44_v8 = vld [vmem:[%s467_s2 + $0x28] sm:$0xff]  ;;  %v297_v9 = vld [vmem:[%s465_s0] sm:$0xff]  ;;  %v42_v10 = vld [vmem:[%s467_s2 + $0x18] sm:$0xff]  ;;  %vm204_vm2 = vcmask 49152   ;;  %s367_s4 = smov [#allocation3]   ;;  %s247_s29 = sshll.u32 %s470_s5, 4  ;;  %s248_s29 = int_to_ptr.hbm [resolvable:$true] %s247_s29 }
   0x8   :  { %v295_v11 = vld [vmem:[%s466_s1 + $0x10] sm:$0xff]  ;;  %v293_v12 = vld [vmem:[%s466_s1] sm:$0xff]  ;;  %v294_v13 = vld [vmem:[%s466_s1 + $0x8] sm:$0xff]  ;;  %s245_s26 = sshll.u32 %s367_s4, 4  ;;  %s246_s26 = int_to_ptr.vmem [resolvable:$true] %s245_s26 }
   0x9   :  { %v39_v14 = vld [vmem:[%s467_s2] sm:$0xff]  ;;  %v40_v15 = vld [vmem:[%s467_s2 + $0x8] sm:$0xff]  ;;  %v296_v16 = vld [vmem:[%s466_s1 + $0x18] sm:$0xff] }
   0xa   :  { %306 = vmatpush.bf16.msra.mxu3 %v298_v6  ;;  %150 = vmatpush.bf16.msra.mxu0 %v298_v6  ;;  %v181_v53 = vld [vmem:[%s468_s3] sm:$0x1]  ;;  %s366_s3 = smov 121  }
   0xb   :  { %305 = vmatpush.bf16.msra.mxu2 %v298_v6  ;;  %84 = vperm.xlu0 %312, %v46_v7  }
   0xc   :  { %74 = vperm.xlu1 %313, %v44_v8  }
   0xd   :  { %64 = vperm.xlu2 %314, %v42_v10  }
   0xe   :  { %308 = vmatpush.bf16.msra.mxu3 %v297_v9  ;;  %151 = vmatpush.bf16.msra.mxu0 %v297_v9 }
   0xf   :  { %307 = vmatpush.bf16.msra.mxu2 %v297_v9 }
  0x11   :  { %290 = vmatmul.msk.bf16.vlgmr.msra.gmra.mxu3 %vm131_vm0, %v295_v11  ;;  %288 = vmatmul.msk.bf16.vlgmr.msra.gmra.mxu0 %vm131_vm0, %v293_v12 }
  0x12   :  { %289 = vmatmul.msk.bf16.vlgmr.msra.gmra.mxu2 %vm131_vm0, %v294_v13 }
  0x13   :  { %49 = vperm.xlu0 %312, %v39_v14  }
  0x14   :  { %54 = vperm.xlu1 %313, %v40_v15  }
  0x21   :  { %291 = vmatmul.msk.bf16.gmra.mxu3 %vm131_vm0, %v296_v16 }
  0x5f   :  { %v60_v21 = vpop.permute.xlu2 %59 }
  0x67   :  { %v65_v31 = vpop.permute.xlu2 %64 }
  0x75   :  { %v80_v19 = vpop.permute.xlu0 %79 }
  0x76   :  { %v70_v20 = vpop.permute.xlu1 %69 }
  0x7d   :  { %v85_v24 = vpop.permute.xlu0 %84 }
  0x7e   :  { %v75_v25 = vpop.permute.xlu1 %74 }
  0x85   :  { %v50_v35 = vpop.permute.xlu0 %49 }
  0x86   :  { %v55_v37 = vpop.permute.xlu1 %54 }
  0x8e   :  { %v153_v26 = vpop.f32.mrf.mxu0 }
  0x8f   :  { %v154_v40 = vadd.f32 %v153_v26, %v50_v35 }
  0x94   :  { %v163_v17 = vpop.f32.mrf.mxu3 }
  0x95   :  { %v158_v22 = vpop.f32.mrf.mxu2  ;;  %v164_v33 = vadd.f32 %v163_v17, %v70_v20 }
  0x96   :  { %v159_v34 = vadd.f32 %v158_v22, %v60_v21  ;;  %v155_v38 = vpop.f32.mrf.mxu0 }
  0x97   :  { %v156_v42 = vadd.f32 %v155_v38, %v55_v37 }
  0x9c   :  { %v165_v18 = vpop.f32.mrf.mxu3 }
  0x9d   :  { %v166_v29 = vadd.f32 %v165_v18, %v75_v25  ;;  %v160_v32 = vpop.f32.mrf.mxu2 }
  0x9e   :  { %v161_v36 = vadd.f32 %v160_v32, %v65_v31 }
  0xa4   :  { %v168_v23 = vpop.f32.mrf.mxu3 }
  0xa5   :  { %v169_v27 = vadd.f32 %v168_v23, %v80_v19 }
  0xa7   :  { %315 = vtanh.f32 %v169_v27 }
  0xac   :  { %v170_v28 = vpop.f32.mrf.mxu3 }
  0xad   :  { %v171_v30 = vadd.f32 %v170_v28, %v85_v24  ;;  %v316_v39 = vpop.eup %315 }
  0xaf   :  { %317 = vtanh.f32 %v171_v30 }
  0xb0   :  { %319 = vtanh.f32 %v166_v29 }
  0xb1   :  { %321 = vtanh.f32 %v164_v33 }
  0xb2   :  { %323 = vtanh.f32 %v159_v34 }
  0xb3   :  { %325 = vtanh.f32 %v161_v36 }
  0xb4   :  { %327 = vtanh.f32 %v154_v40 }
  0xb5   :  { %v318_v41 = vpop.eup %317  ;;  %329 = vtanh.f32 %v156_v42 }
  0xb6   :  { %v185_v43 = vpack.c.bf16 %v318_v41, %v316_v39  ;;  %v320_v44 = vpop.eup %319 }
  0xb7   :  { %v322_v45 = vpop.eup %321 }
  0xb8   :  { %195 = vmatpush.bf16.msra.mxu1 %v185_v43  ;;  %v324_v46 = vpop.eup %323  ;;  %v184_v47 = vpack.c.bf16 %v320_v44, %v322_v45 }
  0xb9   :  { %v326_v48 = vpop.eup %325 }
  0xba   :  { %v328_v49 = vpop.eup %327  ;;  %v183_v50 = vpack.c.bf16 %v326_v48, %v324_v46 }
  0xbb   :  { %v330_v51 = vpop.eup %329 }
  0xbc   :  { %196 = vmatpush.bf16.msra.mxu1 %v184_v47  ;;  %v182_v52 = vpack.c.bf16 %v330_v51, %v328_v49 }
  0xc0   :  { %197 = vmatpush.bf16.msra.mxu1 %v183_v50 }
  0xc4   :  { %198 = vmatpush.bf16.msra.mxu1 %v182_v52 }
  0xc7   :  { %292 = vmatmul.msk.bf16.vlgmr.msra.gmra.mxu1 %vm131_vm0, %v181_v53 }
 0x144   :  { %v200_v55 = vpop.f32.mrf.mxu1 }
 0x145   :  { %v201_v56 = vadd.f32 %v200_v55, %v187_v54 }
 0x147   :  { %v219_v57 = vsel %vm218_vm1, %v201_v56, -inf  ;;  %v205_v58 = vsel %vm204_vm2, %v201_v56, -inf }
 0x148   :  { %220 = vmax.xlane.f32.xlu2 %v219_v57  ;;  %206 = vmax.xlane.f32.xlu1 %v205_v58 }
 0x14c   :  { %v202_v59 = vpop.f32.mrf.mxu1 }
 0x1bb   :  { %v221_v60 = vpop.xlane.xlu2 %220  ;;  %v207_v61 = vpop.xlane.xlu1 %206 }
 0x1bc   :  { %v222_v62 = vsub.f32 %v201_v56, %v221_v60  ;;  %v208_v63 = vsub.f32 %v201_v56, %v207_v61 }
 0x1be   :  { %v223_v0 = vmul.f32 1.442695, %v222_v62  ;;  %v209_v1 = vmul.f32 1.442695, %v208_v63 }
 0x1c0   :  { %331 = vpow2.f32 %v223_v0 }
 0x1c1   :  { %333 = vpow2.f32 %v209_v1 }
 0x1c6   :  { %v332_v2 = vpop.eup %331 }
 0x1c7   :  { %v334_v3 = vpop.eup %333  ;;  %226 = vrot.lane.b32.xlu0 %v332_v2, %s366_s3 }
 0x1c8   :  { %v211_v4 = vsel %vm204_vm2, %v334_v3, 0.0 }
 0x1c9   :  { %212 = vadd.xlane.f32.xlu2 %v211_v4 }
 0x239   :  { %v227_v5 = vpop.permute.xlu0 %226 }
 0x23a   :  { %v229_v6 = vsel %vm204_vm2, %v227_v5, 0.0 }
 0x23b   :  { %230 = vadd.xlane.f32.xlu0 %v229_v6 }
 0x23c   :  { %v213_v7 = vpop.xlane.xlu2 %212 }
 0x23d   :  { %335 = vlog2.f32 %v213_v7 }
 0x243   :  { %v336_v8 = vpop.eup %335 }
 0x244   :  { %v215_v9 = vmul.f32 0.6931472, %v336_v8 }
 0x246   :  { %v216_v10 = vsub.f32 %v208_v63, %v215_v9 }
 0x248   :  { %217 = vst.msk [vmem:[#allocation3] sm:$0x1] %vm204_vm2, %v216_v10 }
 0x2ae   :  { %v231_v11 = vpop.xlane.xlu0 %230 }
 0x2af   :  { %337 = vlog2.f32 %v231_v11 }
 0x2b5   :  { %v338_v12 = vpop.eup %337 }
 0x2b6   :  { %v233_v13 = vmul.f32 0.6931472, %v338_v12 }
 0x2b8   :  { %v234_v14 = vsub.f32 %v222_v62, %v233_v13 }
 0x2ba   :  { %236 = vrot.lane.b32.xlu2 %v234_v14, %s366_s3 }
 0x314   :  { %v237_v15 = vpop.permute.xlu2 %236 }
 0x315   :  { %239 = vst.msk [vmem:[#allocation3 + $0x1] sm:$0x1] %vm204_vm2, %v237_v15 }
 0x316   :  { %250 = dma.vmem_to_hbm [thread:$0]  %s246_s26, 32, %s248_s29, [#allocation4]  }
 0x317   :  { %363 = dma.done.wait [#allocation4], 32  }
 0x318   :  { %364 = vsyncadd [#allocation4], 4294967264 }
 0x319   :  { %255 = vsyncpa [#allocation4], 1 }

</bundles_post_ra>
